<compile_context>
chip_gen: v5e
topology: v5e:2x2
jax: 0.10.0
libtpu: 0.0.40
codegen_flags: <defaults>
</compile_context>

<pallas_src>
import functools

import jax
import jax.numpy as jnp
from jax import lax
from jax.experimental import pallas as pl
from jax.experimental.pallas import tpu as pltpu

_LANE = 128
_SUBLANE = 8
# Single-tile fast path if the whole (rows, 128) slab fits comfortably in VMEM:
# 2048 rows -> 2 inputs x 1 MiB = 2 MiB, fine on every generation (v7x: 64 MiB phys).
_SINGLE_TILE_MAX_ROWS = 2048
# Tiled-path row tile: 2 inputs x 2 pipeline buffers x 1024*128*4 B = 2 MiB of buffers,
# well under the default scoped VMEM on all generations; large enough to approach the
# HBM roofline (this kernel is memory-bound: ~1 EUP exp + a handful of VPU ops / elem).
_TILE_ROWS = 1024


def _bce_term(x, y):
    x = x.astype(jnp.float32)
    y = y.astype(jnp.float32)
    # Numerically stable BCE with logits (matches PyTorch's formulation):
    #   max(x, 0) - x*y + log(1 + exp(-|x|))
    return jnp.maximum(x, 0.0) - x * y + jnp.log1p(jnp.exp(-jnp.abs(x)))


def _mask_tail(term, base, valid_n):
    rows, lane = term.shape
    row_idx = lax.broadcasted_iota(jnp.int32, (rows, lane), 0)
    col_idx = lax.broadcasted_iota(jnp.int32, (rows, lane), 1)
    flat = base + row_idx * lane + col_idx
    return jnp.where(flat < valid_n, term, 0.0)


def _bce_single_tile_kernel(x_ref, y_ref, o_ref, *, valid_n, padded, inv_n):
    # grid=(1,): no init/finalize branches, no per-step scalar read-modify-write.
    term = _bce_term(x_ref[...], y_ref[...])
    if padded:  # static Python branch: only emitted when size % 128 != 0
        term = _mask_tail(term, 0, valid_n)
    # Fold the mean's 1/N (a compile-time constant) into the single scalar store.
    o_ref[0, 0] = jnp.sum(term) * inv_n


def _bce_tiled_kernel(x_ref, y_ref, o_ref, acc_ref, *, valid_n, padded, tm, inv_n):
    i = pl.program_id(0)

    @pl.when(i == 0)
    def _():
        acc_ref[...] = jnp.zeros_like(acc_ref)

    term = _bce_term(x_ref[...], y_ref[...])
    if padded:  # static Python branch
        term = _mask_tail(term, i * (tm * _LANE), valid_n)

    # Fold the (tm, 128) tile into the persistent (8, 128) VMEM accumulator with pure
    # VPU adds (leading-dim split reshape is layout-free); the single cross-lane /
    # cross-sublane reduce happens once at the final step.
    acc_ref[...] += jnp.sum(term.reshape(tm // _SUBLANE, _SUBLANE, _LANE), axis=0)

    @pl.when(i == pl.num_programs(0) - 1)
    def _():
        o_ref[0, 0] = jnp.sum(acc_ref[...]) * inv_n


def facenet_loss(prediction, target):
    """BCEWithLogitsLoss(prediction, target), mean reduction, via Pallas TPU."""
    assert prediction.shape == target.shape
    total_n = prediction.size
    inv_n = 1.0 / float(total_n)

    # Flatten to a lane-dense slab; no dtype cast here (cast happens in-kernel).
    flat_x = prediction.reshape(-1)
    flat_y = target.reshape(-1)

    if total_n <= _SINGLE_TILE_MAX_ROWS * _LANE:
        chunk = _LANE  # only lane alignment needed for the single-tile path
    else:
        chunk = _TILE_ROWS * _LANE

    pad = (-total_n) % chunk
    padded = pad != 0
    if padded:
        # Zero-pad; exact correctness via in-kernel mask.  Never triggered for 2x4x16x16.
        flat_x = jnp.pad(flat_x, (0, pad))
        flat_y = jnp.pad(flat_y, (0, pad))

    rows = flat_x.size // _LANE
    x2d = flat_x.reshape(rows, _LANE)
    y2d = flat_y.reshape(rows, _LANE)

    if rows <= _SINGLE_TILE_MAX_ROWS:
        out = pl.pallas_call(
            functools.partial(
                _bce_single_tile_kernel,
                valid_n=total_n, padded=padded, inv_n=inv_n),
            out_shape=jax.ShapeDtypeStruct((1, 1), jnp.float32),
            grid_spec=pltpu.PrefetchScalarGridSpec(
                num_scalar_prefetch=0,
                grid=(1,),
                in_specs=[
                    pl.BlockSpec((rows, _LANE), lambda i: (0, 0)),
                    pl.BlockSpec((rows, _LANE), lambda i: (0, 0)),
                ],
                out_specs=pl.BlockSpec(memory_space=pltpu.SMEM),
            ),
            compiler_params=pltpu.CompilerParams(
                dimension_semantics=("arbitrary",)),
        )(x2d, y2d)
    else:
        tm = _TILE_ROWS
        grid = (rows // tm,)
        # NOTE(v7x): for very large inputs, a leading "parallel" grid axis writing
        # per-core partial sums would use both TensorCores; the SMEM-scalar reduce
        # here requires the single "arbitrary" axis (serial on one TC).
        out = pl.pallas_call(
            functools.partial(
                _bce_tiled_kernel,
                valid_n=total_n, padded=padded, tm=tm, inv_n=inv_n),
            out_shape=jax.ShapeDtypeStruct((1, 1), jnp.float32),
            grid_spec=pltpu.PrefetchScalarGridSpec(
                num_scalar_prefetch=0,
                grid=grid,
                in_specs=[
                    pl.BlockSpec((tm, _LANE), lambda i: (i, 0)),
                    pl.BlockSpec((tm, _LANE), lambda i: (i, 0)),
                ],
                out_specs=pl.BlockSpec(memory_space=pltpu.SMEM),
                scratch_shapes=[pltpu.VMEM((_SUBLANE, _LANE), jnp.float32)],
            ),
            compiler_params=pltpu.CompilerParams(
                dimension_semantics=("arbitrary",),
                vmem_limit_bytes=64 * 1024 * 1024),
        )(x2d, y2d)

    # The 1/N mean factor is already folded into the kernel's scalar write.
    return out[0, 0]


if __name__ == "__main__":
    key = jax.random.PRNGKey(0)
    k1, k2 = jax.random.split(key)

    # Shapes consistent with the module's forward: prediction (logits) and
    # target (probabilities in [0, 1]) of the same shape.
    prediction = jax.random.normal(k1, (2, 4, 16, 16), dtype=jnp.float32)
    target = jax.random.uniform(k2, (2, 4, 16, 16), dtype=jnp.float32)

    loss = facenet_loss(prediction, target)
    jax.block_until_ready(loss)

    # Reference check (plain JAX) for correctness.
    x = prediction.astype(jnp.float32)
    y = target.astype(jnp.float32)
    ref = jnp.mean(jnp.maximum(x, 0.0) - x * y + jnp.log1p(jnp.exp(-jnp.abs(x))))
    assert jnp.allclose(loss, ref, rtol=1e-5, atol=1e-5), (loss, ref)

    print("KERNEL_OK")
</pallas_src>

<mosaic_0001>
module attributes {stable_mosaic.version = 11 : i64} {
  func.func @_bce_single_tile_kernel(%arg0: i32, %arg1: memref<16x128xf32, #tpu.memory_space<vmem>>, %arg2: memref<16x128xf32, #tpu.memory_space<vmem>>, %arg3: memref<1x1xf32, #tpu.memory_space<smem>>) attributes {dimension_semantics = [#tpu.dimension_semantics<arbitrary>], iteration_bounds = array<i64: 1>, scalar_prefetch = 0 : i64, scratch_operands = 0 : i64, tpu.core_type = #tpu.core_type<tc>, window_params = [{pipeline_mode = #tpu.pipeline_mode<synchronous>, transform_indices = @transform_0, window_bounds = array<i64: 16, 128>}, {pipeline_mode = #tpu.pipeline_mode<synchronous>, transform_indices = @transform_1, window_bounds = array<i64: 16, 128>}, {transform_indices = @transform_2, window_bounds = array<i64: 1, 1>}]} {
    %c0 = arith.constant 0 : index
    %c0_0 = arith.constant 0 : index
    %0 = vector.load %arg1[%c0, %c0_0] : memref<16x128xf32, #tpu.memory_space<vmem>>, vector<16x128xf32>
    %c0_1 = arith.constant 0 : index
    %c0_2 = arith.constant 0 : index
    %1 = vector.load %arg2[%c0_1, %c0_2] : memref<16x128xf32, #tpu.memory_space<vmem>>, vector<16x128xf32>
    %cst = arith.constant 0.000000e+00 : f32
    %2 = vector.broadcast %cst : f32 to vector<16x128xf32>
    %3 = arith.maximumf %0, %2 : vector<16x128xf32>
    %4 = arith.mulf %0, %1 : vector<16x128xf32>
    %5 = arith.subf %3, %4 : vector<16x128xf32>
    %6 = math.absf %0 : vector<16x128xf32>
    %cst_3 = arith.constant 0.000000e+00 : f32
    %7 = vector.broadcast %cst_3 : f32 to vector<16x128xf32>
    %8 = arith.subf %7, %6 : vector<16x128xf32>
    %9 = math.exp %8 : vector<16x128xf32>
    %10 = math.log1p %9 : vector<16x128xf32>
    %11 = arith.addf %5, %10 : vector<16x128xf32>
    %12 = vector.shape_cast %11 : vector<16x128xf32> to vector<1x16x128xf32>
    %cst_4 = arith.constant dense<0.000000e+00> : vector<1xf32>
    %13 = vector.multi_reduction <add>, %12, %cst_4 [1, 2] : vector<1x16x128xf32> to vector<1xf32>
    %14 = vector.shape_cast %13 : vector<1xf32> to vector<1x1x1xf32>
    %15 = vector.extract %14[0, 0, 0] : f32 from vector<1x1x1xf32>
    %cst_5 = arith.constant 4.8828125E-4 : f32
    %16 = arith.mulf %15, %cst_5 : f32
    %c0_6 = arith.constant 0 : index
    %c0_7 = arith.constant 0 : index
    %17 = memref.load %arg3[%c0_6, %c0_7] : memref<1x1xf32, #tpu.memory_space<smem>>
    memref.store %16, %arg3[%c0_6, %c0_7] : memref<1x1xf32, #tpu.memory_space<smem>>
    return
  }
  func.func @transform_0(%arg0: i32) -> (i32, i32) {
    %c0_i32 = arith.constant 0 : i32
    %c0_i32_0 = arith.constant 0 : i32
    %c0_i32_1 = arith.constant 0 : i32
    return %c0_i32, %c0_i32_0 : i32, i32
  }
  func.func @transform_1(%arg0: i32) -> (i32, i32) {
    %c0_i32 = arith.constant 0 : i32
    %c0_i32_0 = arith.constant 0 : i32
    %c0_i32_1 = arith.constant 0 : i32
    return %c0_i32, %c0_i32_0 : i32, i32
  }
  func.func @transform_2(%arg0: i32) -> (i32, i32) {
    %c0_i32 = arith.constant 0 : i32
    %c0_i32_0 = arith.constant 0 : i32
    %c0_i32_1 = arith.constant 0 : i32
    return %c0_i32, %c0_i32_0 : i32, i32
  }
}

</mosaic_0001>

<bundles_post_ra>
// kernel: tpu_custom_call.1
= control target key start
LH: loop header
LB: loop body
LE: loop exit
PB: predicated region body
PF: predicated region fallthrough
CT: control target
= control target key end

     0   :  { %7 = vsyncpa [#allocation3], 0  ;;  %s222_s0 = inlined_call_operand.hbm [shape: f32[16,128], index: 0, kind: input, shape index: {}]   ;;  %s223_s1 = inlined_call_operand.hbm [shape: f32[16,128], index: 1, kind: input, shape index: {}]   ;;  %s224_s2 = inlined_call_operand.hbm [shape: f32[1,1], index: 2, kind: output, shape index: {}]  }
   0x1   :  { %8 = vsyncpa [#allocation6], 0 }
   0x2   :  { %9 = vsyncpa [#allocation4], 0  ;;  %s14_s11 = sshll.u32 %s222_s0, 4  ;;  %s193_s12 = smov [#allocation2]   ;;  %s15_s11 = int_to_ptr.hbm [resolvable:$true] %s14_s11 }
   0x3   :  { %s16_s13 = sshll.u32 %s193_s12, 4  ;;  %s27_s16 = sshll.u32 %s223_s1, 4  ;;  %s17_s13 = int_to_ptr.vmem [resolvable:$true] %s16_s13  ;;  %s28_s16 = int_to_ptr.hbm [resolvable:$true] %s27_s16 }
   0x4   :  { %s194_s17 = smov 128   ;;  %s195_s18 = smov 8  }
   0x5   :  { %22 = dma.hbm_to_vmem [thread:$0]  %s15_s11, 256, %s17_s13, [#allocation3], %s194_s17, %s194_s17, %s195_s18  }
   0x6   :  { %s196_s19 = smov [#allocation5]  }
   0x7   :  { %s29_s20 = sshll.u32 %s196_s19, 4  ;;  %s30_s20 = int_to_ptr.vmem [resolvable:$true] %s29_s20 }
   0x8   :  { %35 = dma.hbm_to_vmem [thread:$0]  %s28_s16, 256, %s30_s20, [#allocation6], %s194_s17, %s194_s17, %s195_s18  }
   0x9   :  { %187 = dma.done.wait [#allocation3], 256  }
   0xa   :  { %188 = vsyncadd [#allocation3], 4294967040 }
   0xb   :  { %189 = dma.done.wait [#allocation6], 256  }
   0xc   :  { %190 = vsyncadd [#allocation6], 4294967040  ;;  %v44_v0 = vld [vmem:[#allocation2] sm:$0xff]  ;;  %v45_v1 = vld [vmem:[#allocation2 + $0x8] sm:$0xff]  ;;  %s100_s21 = sshll.u32 %s224_s2, 4  ;;  %s197_s24 = smov [#allocation7]   ;;  %s101_s21 = int_to_ptr.hbm [resolvable:$true] %s100_s21 }
   0xd   :  { %v54_v2 = vand.u32 2147483647, %v44_v0  ;;  %v55_v3 = vand.u32 2147483647, %v45_v1  ;;  %v46_v12 = vld [vmem:[#allocation5] sm:$0xff]  ;;  %v47_v15 = vld [vmem:[#allocation5 + $0x8] sm:$0xff] }
   0xe   :  { %v48_v17 = vmax.f32 %v44_v0, 0.0  ;;  %v50_v18 = vmul.f32 %v46_v12, %v44_v0  ;;  %v49_v21 = vmax.f32 %v45_v1, 0.0  ;;  %v51_v22 = vmul.f32 %v47_v15, %v45_v1 }
   0xf   :  { %v56_v4 = vsub.f32 0.0, %v54_v2  ;;  %v57_v5 = vsub.f32 0.0, %v55_v3 }
  0x10   :  { %v52_v26 = vsub.f32 %v48_v17, %v50_v18  ;;  %v53_v29 = vsub.f32 %v49_v21, %v51_v22 }
  0x11   :  { %v58_v6 = vmul.f32 1.442695, %v56_v4  ;;  %v60_v7 = vmul.f32 1.442695, %v57_v5 }
  0x13   :  { %119 = vpow2.f32 %v58_v6 }
  0x14   :  { %121 = vpow2.f32 %v60_v7 }
  0x19   :  { %v120_v8 = vpop.eup %119 }
  0x1a   :  { %v122_v9 = vpop.eup %121  ;;  %v62_v10 = vadd.f32 1.0, %v120_v8  ;;  %v65_v11 = vmul.f32 -0.5, %v120_v8  ;;  %v68_v19 = vand.u32 2147483647, %v120_v8 }
  0x1b   :  { %v71_v13 = vadd.f32 1.0, %v122_v9  ;;  %v74_v14 = vmul.f32 -0.5, %v122_v9  ;;  %v77_v23 = vand.u32 2147483647, %v122_v9 }
  0x1c   :  { %123 = vlog2.f32 %v62_v10  ;;  %v66_v16 = vadd.f32 1.0, %v65_v11  ;;  %vm69_vm0 = vcmp.lt.f32.partialorder %v68_v19, 0.0004427343 }
  0x1d   :  { %125 = vlog2.f32 %v71_v13  ;;  %v75_v20 = vadd.f32 1.0, %v74_v14  ;;  %vm78_vm1 = vcmp.lt.f32.partialorder %v77_v23, 0.0004427343 }
  0x1e   :  { %v67_v24 = vmul.f32 %v120_v8, %v66_v16 }
  0x1f   :  { %v76_v27 = vmul.f32 %v122_v9, %v75_v20 }
  0x22   :  { %v124_v25 = vpop.eup %123 }
  0x23   :  { %v126_v28 = vpop.eup %125  ;;  %v64_v30 = vmul.f32 0.6931472, %v124_v25 }
  0x24   :  { %v73_v31 = vmul.f32 0.6931472, %v126_v28 }
  0x25   :  { %v70_v32 = vsel %vm69_vm0, %v67_v24, %v64_v30 }
  0x26   :  { %v79_v33 = vsel %vm78_vm1, %v76_v27, %v73_v31  ;;  %v80_v34 = vadd.f32 %v70_v32, %v52_v26 }
  0x27   :  { %v81_v35 = vadd.f32 %v79_v33, %v53_v29 }
  0x29   :  { %v82_v36 = vadd.f32 %v81_v35, %v80_v34 }
  0x2b   :  { %83 = vadd.xlane.f32.xlu0 %v82_v36 }
  0x9e   :  { %v84_v37 = vpop.xlane.xlu0 %83 }
  0x9f   :  { %v85_v38 = vrot.slane %v84_v37, 4 }
  0xa1   :  { %v86_v39 = vadd.f32 %v85_v38, %v84_v37 }
  0xa3   :  { %v87_v40 = vrot.slane %v86_v39, 2 }
  0xa5   :  { %v88_v41 = vadd.f32 %v87_v40, %v86_v39 }
  0xa7   :  { %v89_v42 = vrot.slane %v88_v41, 1 }
  0xa9   :  { %v90_v43 = vadd.f32 %v89_v42, %v88_v41 }
  0xab   :  { %112 = vpush %v90_v43 }
  0xdc   :  { %s113_s22 = spop %112 }
  0xdd   :  { %s92_s23 = smul.f32 0.00048828125, %s113_s22 }
  0xdf   :  { %94 = sst [smem:[#allocation7]] %s92_s23 }
  0xe0   :  { %103 = dma.smem_to_hbm %s197_s24, 16, %s101_s21, [#allocation4]  }
  0xe1   :  { %191 = dma.done.wait [#allocation4], 16  }
  0xe2   :  { %192 = vsyncadd [#allocation4], 4294967280 }
  0xe3   :  { %108 = sfence }
  0xe4   :  { %109 = vsyncpa [#allocation3], 1 }
  0xe5   :  { %110 = vsyncpa [#allocation6], 1 }
  0xe6   :  { %111 = vsyncpa [#allocation4], 1 }

</bundles_post_ra>
